<compile_context>
chip_gen: v6e
topology: v6e:2x2x1
jax: 0.10.0
libtpu: 0.0.40
codegen_flags: <defaults>
</compile_context>

<pallas_src>
import jax
import jax.numpy as jnp
from jax.experimental import pallas as pl
from jax.experimental.pallas import tpu as pltpu


IN_FEATS = 1433
HIDDEN = 16
OUT_FEATS = 7

IN_PAD = 1536   # round_up(1433, 128): full MXU K-chunks
F_PAD = 128     # lane-dense width for hidden / output feature dims


def _round_up(x, m):
    return (x + m - 1) // m * m


def _choose_tiling(n):
    """Pick (tile_m, n_pad) so that:
       * tile_m is a multiple of 16 (bf16 sublane packing) and <= 512,
       * n_pad = steps * tile_m with an even number of steps >= 2
         (v7x has 2 TensorCores sharding the 'parallel' axis)."""
    steps = max(2, -(-n // 512))
    if steps % 2:
        steps += 1
    tile_m = _round_up(-(-n // steps), 16)
    return tile_m, steps * tile_m


# ---------------------------------------------------------------- kernels ---

def transform_kernel(x_ref, w_ref, o_ref):
    """o = (x @ w) cast to bf16.  One row-tile of x; w fully resident (f32)."""
    o_ref[...] = jnp.dot(x_ref[...], w_ref[...],
                         preferred_element_type=jnp.float32).astype(o_ref.dtype)


def agg1_fused_kernel(a_ref, z_ref, b1_ref, w2_ref, o_ref):
    """o = (relu(a @ z + b1)) @ w2, emitted as bf16.

    a (bf16, exact 0/1) and z (bf16) feed the MXU directly at native bf16
    rate with f32 accumulation.  The tiny (tile_m,128)x(128,128) layer-2
    transform is fused into the epilogue so h1 never touches HBM.
    """
    h1 = jnp.dot(a_ref[...], z_ref[...], preferred_element_type=jnp.float32)
    h1 = jnp.maximum(h1 + b1_ref[...], 0.0)
    o_ref[...] = jnp.dot(h1, w2_ref[...],
                         preferred_element_type=jnp.float32).astype(o_ref.dtype)


def agg2_kernel(a_ref, z_ref, b2_ref, o_ref):
    """o = a @ z + b2 (bf16 x bf16 -> f32), final logits tile in f32."""
    out = jnp.dot(a_ref[...], z_ref[...], preferred_element_type=jnp.float32)
    o_ref[...] = out + b2_ref[...]


# --------------------------------------------------------------- wrappers ---

def _transform(x, w, tile_m):
    """(N_pad, K) f32 @ (K, F_PAD) f32 -> (N_pad, F_PAD) bf16, row-tiled."""
    n, k = x.shape
    f = w.shape[1]
    return pl.pallas_call(
        transform_kernel,
        out_shape=jax.ShapeDtypeStruct((n, f), jnp.bfloat16),
        grid_spec=pltpu.PrefetchScalarGridSpec(
            num_scalar_prefetch=0,
            grid=(n // tile_m,),
            in_specs=[
                pl.BlockSpec((tile_m, k), lambda i: (i, 0)),
                pl.BlockSpec((k, f), lambda i: (0, 0),
                             pipeline_mode=pl.Buffered(1)),
            ],
            out_specs=pl.BlockSpec((tile_m, f), lambda i: (i, 0)),
        ),
        compiler_params=pltpu.CompilerParams(
            dimension_semantics=("parallel",)),
    )(x, w)


def _aggregate_fused(a_bf16, z, b1, w2, tile_m):
    """relu((N_pad,N_pad)bf16 @ (N_pad,F)bf16 + b1) @ W2 -> (N_pad,F) bf16."""
    n = a_bf16.shape[0]
    f = z.shape[1]
    return pl.pallas_call(
        agg1_fused_kernel,
        out_shape=jax.ShapeDtypeStruct((n, f), jnp.bfloat16),
        grid_spec=pltpu.PrefetchScalarGridSpec(
            num_scalar_prefetch=0,
            grid=(n // tile_m,),
            in_specs=[
                pl.BlockSpec((tile_m, n), lambda i: (i, 0)),
                pl.BlockSpec((n, f), lambda i: (0, 0),
                             pipeline_mode=pl.Buffered(1)),
                pl.BlockSpec((1, f), lambda i: (0, 0),
                             pipeline_mode=pl.Buffered(1)),
                pl.BlockSpec((f, f), lambda i: (0, 0),
                             pipeline_mode=pl.Buffered(1)),
            ],
            out_specs=pl.BlockSpec((tile_m, f), lambda i: (i, 0)),
        ),
        compiler_params=pltpu.CompilerParams(
            dimension_semantics=("parallel",)),
    )(a_bf16, z, b1, w2)


def _aggregate_final(a_bf16, z, b2, tile_m):
    """(N_pad,N_pad)bf16 @ (N_pad,F)bf16 + b2 -> (N_pad,F) f32 logits."""
    n = a_bf16.shape[0]
    f = z.shape[1]
    return pl.pallas_call(
        agg2_kernel,
        out_shape=jax.ShapeDtypeStruct((n, f), jnp.float32),
        grid_spec=pltpu.PrefetchScalarGridSpec(
            num_scalar_prefetch=0,
            grid=(n // tile_m,),
            in_specs=[
                pl.BlockSpec((tile_m, n), lambda i: (i, 0)),
                pl.BlockSpec((n, f), lambda i: (0, 0),
                             pipeline_mode=pl.Buffered(1)),
                pl.BlockSpec((1, f), lambda i: (0, 0),
                             pipeline_mode=pl.Buffered(1)),
            ],
            out_specs=pl.BlockSpec((tile_m, f), lambda i: (i, 0)),
        ),
        compiler_params=pltpu.CompilerParams(
            dimension_semantics=("parallel",)),
    )(a_bf16, z, b2)


def gcn_net_forward(adj, features, w1_t, b1, w2_t, b2):
    """adj: (N, N) f32 {0,1}; features: (N, 1433) f32;
    w1_t: (1433, 16), b1: (1, 16), w2_t: (16, 7), b2: (1, 7).
    Returns logits (N, 7) f32, matching Net.forward (up to bf16 rounding of
    the aggregation operands)."""
    n = features.shape[0]
    tile_m, n_pad = _choose_tiling(n)

    # Zero-padded, TPU-friendly operands (all padding contributes exact zeros).
    # For a graph that is static across calls, hoist x_pad / a_bf16 out of the
    # jitted forward so they are built once.
    x_pad = jnp.zeros((n_pad, IN_PAD), jnp.float32).at[:n, :IN_FEATS].set(features)
    # Padded adjacency built directly in bf16 (exact for 0/1 values): no
    # N_pad^2 f32 intermediate is ever materialized.
    a_bf16 = jnp.zeros((n_pad, n_pad), jnp.bfloat16).at[:n, :n].set(
        adj.astype(jnp.bfloat16))

    w1_pad = jnp.zeros((IN_PAD, F_PAD), jnp.float32).at[:IN_FEATS, :HIDDEN].set(w1_t)
    b1_pad = jnp.zeros((1, F_PAD), jnp.float32).at[:, :HIDDEN].set(b1)
    w2_pad = jnp.zeros((F_PAD, F_PAD), jnp.float32).at[:HIDDEN, :OUT_FEATS].set(w2_t)
    b2_pad = jnp.zeros((1, F_PAD), jnp.float32).at[:, :OUT_FEATS].set(b2)

    # Layer 1 transform (associativity reorder): Z = X @ W1, emitted in bf16.
    z1 = _transform(x_pad, w1_pad, tile_m)                       # (N_pad, 128) bf16
    # Fused layer-1 aggregate + layer-2 transform:
    #   HW2 = relu(A @ Z + b1) @ W2
    hw2 = _aggregate_fused(a_bf16, z1, b1_pad, w2_pad, tile_m)   # (N_pad, 128) bf16
    # Layer-2 aggregate: out = A @ HW2 + b2
    out = _aggregate_final(a_bf16, hw2, b2_pad, tile_m)          # (N_pad, 128) f32

    return out[:n, :OUT_FEATS]


def reference_forward(adj, features, w1_t, b1, w2_t, b2):
    # Same operation order as the PyTorch module: aggregate, then linear.
    h1 = jnp.maximum((adj @ features) @ w1_t + b1, 0.0)
    return (adj @ h1) @ w2_t + b2


if __name__ == "__main__":
    key = jax.random.PRNGKey(0)
    k_adj, k_x, k_w1, k_b1, k_w2, k_b2 = jax.random.split(key, 6)

    N = 32  # small number of graph nodes for the smoke test
    # TODO(synk): real DGL graphs are sparse; message passing is realized here
    # as a dense adjacency matmul (A[dst, src] = 1), which is exact but dense.

    adj = (jax.random.uniform(k_adj, (N, N)) < 0.1).astype(jnp.float32)
    adj = jnp.maximum(adj, jnp.eye(N, dtype=jnp.float32))   # self loops

    features = jax.random.normal(k_x, (N, IN_FEATS), dtype=jnp.float32)

    # nn.Linear-style fan-in init, weights stored pre-transposed as (in, out).
    s1 = 1.0 / jnp.sqrt(jnp.float32(IN_FEATS))
    s2 = 1.0 / jnp.sqrt(jnp.float32(HIDDEN))
    w1_t = jax.random.uniform(k_w1, (IN_FEATS, HIDDEN), jnp.float32, -s1, s1)
    b1 = jax.random.uniform(k_b1, (1, HIDDEN), jnp.float32, -s1, s1)
    w2_t = jax.random.uniform(k_w2, (HIDDEN, OUT_FEATS), jnp.float32, -s2, s2)
    b2 = jax.random.uniform(k_b2, (1, OUT_FEATS), jnp.float32, -s2, s2)

    fwd = jax.jit(gcn_net_forward)
    out = fwd(adj, features, w1_t, b1, w2_t, b2)
    out = jax.block_until_ready(out)

    ref = reference_forward(adj, features, w1_t, b1, w2_t, b2)
    assert out.shape == (N, OUT_FEATS)
    # Tolerance accounts for bf16 rounding (~2^-8 relative) of the aggregation
    # operands Z / HW2; the graph structure / linear layers are otherwise exact.
    assert jnp.allclose(out, ref, atol=2e-2, rtol=2e-2), "mismatch vs reference"

    print("KERNEL_OK")
</pallas_src>

<mosaic_0001>
module attributes {stable_mosaic.version = 11 : i64} {
  func.func @transform_kernel(%arg0: i32, %arg1: memref<16x1536xf32, #tpu.memory_space<vmem>>, %arg2: memref<1536x128xf32, #tpu.memory_space<vmem>>, %arg3: memref<16x128xbf16, #tpu.memory_space<vmem>>) attributes {dimension_semantics = [#tpu.dimension_semantics<parallel>], iteration_bounds = array<i64: 2>, scalar_prefetch = 0 : i64, scratch_operands = 0 : i64, tpu.core_type = #tpu.core_type<tc>, window_params = [{transform_indices = @transform_0, window_bounds = array<i64: 16, 1536>}, {pipeline_mode = #tpu.pipeline_mode<synchronous>, transform_indices = @transform_1, window_bounds = array<i64: 1536, 128>}, {transform_indices = @transform_2, window_bounds = array<i64: 16, 128>}]} {
    %c0 = arith.constant 0 : index
    %c0_0 = arith.constant 0 : index
    %0 = vector.load %arg1[%c0, %c0_0] : memref<16x1536xf32, #tpu.memory_space<vmem>>, vector<16x1536xf32>
    %c0_1 = arith.constant 0 : index
    %c0_2 = arith.constant 0 : index
    %1 = vector.load %arg2[%c0_1, %c0_2] : memref<1536x128xf32, #tpu.memory_space<vmem>>, vector<1536x128xf32>
    %cst = arith.constant dense<0.000000e+00> : vector<16x128xf32>
    %2 = tpu.matmul %0, %1, %cst {dimension_numbers = #tpu.dot_dimension_numbers<[1], [0], [0], [1], [0, 0, 1, 1], [], []>} : vector<16x1536xf32>, vector<1536x128xf32>, vector<16x128xf32> -> vector<16x128xf32>
    %3 = arith.truncf %2 : vector<16x128xf32> to vector<16x128xbf16>
    %c0_3 = arith.constant 0 : index
    %c0_4 = arith.constant 0 : index
    %4 = vector.load %arg3[%c0_3, %c0_4] : memref<16x128xbf16, #tpu.memory_space<vmem>>, vector<16x128xbf16>
    tpu.vector_store %arg3[%c0_3, %c0_4], %3 {strides = array<i32>} : memref<16x128xbf16, #tpu.memory_space<vmem>>, vector<16x128xbf16>,
    return
  }
  func.func @transform_0(%arg0: i32) -> (i32, i32) {
    %c0_i32 = arith.constant 0 : i32
    %c0_i32_0 = arith.constant 0 : i32
    return %arg0, %c0_i32 : i32, i32
  }
  func.func @transform_1(%arg0: i32) -> (i32, i32) {
    %c0_i32 = arith.constant 0 : i32
    %c0_i32_0 = arith.constant 0 : i32
    %c0_i32_1 = arith.constant 0 : i32
    return %c0_i32, %c0_i32_0 : i32, i32
  }
  func.func @transform_2(%arg0: i32) -> (i32, i32) {
    %c0_i32 = arith.constant 0 : i32
    %c0_i32_0 = arith.constant 0 : i32
    return %arg0, %c0_i32 : i32, i32
  }
}

module attributes {stable_mosaic.version = 11 : i64} {
  func.func @agg1_fused_kernel(%arg0: i32, %arg1: memref<16x32xbf16, #tpu.memory_space<vmem>>, %arg2: memref<32x128xbf16, #tpu.memory_space<vmem>>, %arg3: memref<1x128xf32, #tpu.memory_space<vmem>>, %arg4: memref<128x128xf32, #tpu.memory_space<vmem>>, %arg5: memref<16x128xbf16, #tpu.memory_space<vmem>>) attributes {dimension_semantics = [#tpu.dimension_semantics<parallel>], iteration_bounds = array<i64: 2>, scalar_prefetch = 0 : i64, scratch_operands = 0 : i64, tpu.core_type = #tpu.core_type<tc>, window_params = [{transform_indices = @transform_0, window_bounds = array<i64: 16, 32>}, {pipeline_mode = #tpu.pipeline_mode<synchronous>, transform_indices = @transform_1, window_bounds = array<i64: 32, 128>}, {pipeline_mode = #tpu.pipeline_mode<synchronous>, transform_indices = @transform_2, window_bounds = array<i64: 1, 128>}, {pipeline_mode = #tpu.pipeline_mode<synchronous>, transform_indices = @transform_3, window_bounds = array<i64: 128, 128>}, {transform_indices = @transform_4, window_bounds = array<i64: 16, 128>}]} {
    %c0 = arith.constant 0 : index
    %c0_0 = arith.constant 0 : index
    %0 = vector.load %arg1[%c0, %c0_0] : memref<16x32xbf16, #tpu.memory_space<vmem>>, vector<16x32xbf16>
    %c0_1 = arith.constant 0 : index
    %c0_2 = arith.constant 0 : index
    %1 = vector.load %arg2[%c0_1, %c0_2] : memref<32x128xbf16, #tpu.memory_space<vmem>>, vector<32x128xbf16>
    %cst = arith.constant dense<0.000000e+00> : vector<16x128xf32>
    %2 = tpu.matmul %0, %1, %cst {dimension_numbers = #tpu.dot_dimension_numbers<[1], [0], [0], [1], [0, 0, 1, 1], [], []>} : vector<16x32xbf16>, vector<32x128xbf16>, vector<16x128xf32> -> vector<16x128xf32>
    %c0_3 = arith.constant 0 : index
    %c0_4 = arith.constant 0 : index
    %3 = vector.load %arg3[%c0_3, %c0_4] : memref<1x128xf32, #tpu.memory_space<vmem>>, vector<1x128xf32>
    %4 = vector.broadcast %3 : vector<1x128xf32> to vector<16x128xf32>
    %5 = arith.addf %2, %4 : vector<16x128xf32>
    %cst_5 = arith.constant 0.000000e+00 : f32
    %6 = vector.broadcast %cst_5 : f32 to vector<16x128xf32>
    %7 = arith.maximumf %5, %6 : vector<16x128xf32>
    %c0_6 = arith.constant 0 : index
    %c0_7 = arith.constant 0 : index
    %8 = vector.load %arg4[%c0_6, %c0_7] : memref<128x128xf32, #tpu.memory_space<vmem>>, vector<128x128xf32>
    %cst_8 = arith.constant dense<0.000000e+00> : vector<16x128xf32>
    %9 = tpu.matmul %7, %8, %cst_8 {dimension_numbers = #tpu.dot_dimension_numbers<[1], [0], [0], [1], [0, 0, 1, 1], [], []>} : vector<16x128xf32>, vector<128x128xf32>, vector<16x128xf32> -> vector<16x128xf32>
    %10 = arith.truncf %9 : vector<16x128xf32> to vector<16x128xbf16>
    %c0_9 = arith.constant 0 : index
    %c0_10 = arith.constant 0 : index
    %11 = vector.load %arg5[%c0_9, %c0_10] : memref<16x128xbf16, #tpu.memory_space<vmem>>, vector<16x128xbf16>
    tpu.vector_store %arg5[%c0_9, %c0_10], %10 {strides = array<i32>} : memref<16x128xbf16, #tpu.memory_space<vmem>>, vector<16x128xbf16>,
    return
  }
  func.func @transform_0(%arg0: i32) -> (i32, i32) {
    %c0_i32 = arith.constant 0 : i32
    %c0_i32_0 = arith.constant 0 : i32
    return %arg0, %c0_i32 : i32, i32
  }
  func.func @transform_1(%arg0: i32) -> (i32, i32) {
    %c0_i32 = arith.constant 0 : i32
    %c0_i32_0 = arith.constant 0 : i32
    %c0_i32_1 = arith.constant 0 : i32
    return %c0_i32, %c0_i32_0 : i32, i32
  }
  func.func @transform_2(%arg0: i32) -> (i32, i32) {
    %c0_i32 = arith.constant 0 : i32
    %c0_i32_0 = arith.constant 0 : i32
    %c0_i32_1 = arith.constant 0 : i32
    return %c0_i32, %c0_i32_0 : i32, i32
  }
  func.func @transform_3(%arg0: i32) -> (i32, i32) {
    %c0_i32 = arith.constant 0 : i32
    %c0_i32_0 = arith.constant 0 : i32
    %c0_i32_1 = arith.constant 0 : i32
    return %c0_i32, %c0_i32_0 : i32, i32
  }
  func.func @transform_4(%arg0: i32) -> (i32, i32) {
    %c0_i32 = arith.constant 0 : i32
    %c0_i32_0 = arith.constant 0 : i32
    return %arg0, %c0_i32 : i32, i32
  }
}

module attributes {stable_mosaic.version = 11 : i64} {
  func.func @agg2_kernel(%arg0: i32, %arg1: memref<16x32xbf16, #tpu.memory_space<vmem>>, %arg2: memref<32x128xbf16, #tpu.memory_space<vmem>>, %arg3: memref<1x128xf32, #tpu.memory_space<vmem>>, %arg4: memref<16x128xf32, #tpu.memory_space<vmem>>) attributes {dimension_semantics = [#tpu.dimension_semantics<parallel>], iteration_bounds = array<i64: 2>, scalar_prefetch = 0 : i64, scratch_operands = 0 : i64, tpu.core_type = #tpu.core_type<tc>, window_params = [{transform_indices = @transform_0, window_bounds = array<i64: 16, 32>}, {pipeline_mode = #tpu.pipeline_mode<synchronous>, transform_indices = @transform_1, window_bounds = array<i64: 32, 128>}, {pipeline_mode = #tpu.pipeline_mode<synchronous>, transform_indices = @transform_2, window_bounds = array<i64: 1, 128>}, {transform_indices = @transform_3, window_bounds = array<i64: 16, 128>}]} {
    %c0 = arith.constant 0 : index
    %c0_0 = arith.constant 0 : index
    %0 = vector.load %arg1[%c0, %c0_0] : memref<16x32xbf16, #tpu.memory_space<vmem>>, vector<16x32xbf16>
    %c0_1 = arith.constant 0 : index
    %c0_2 = arith.constant 0 : index
    %1 = vector.load %arg2[%c0_1, %c0_2] : memref<32x128xbf16, #tpu.memory_space<vmem>>, vector<32x128xbf16>
    %cst = arith.constant dense<0.000000e+00> : vector<16x128xf32>
    %2 = tpu.matmul %0, %1, %cst {dimension_numbers = #tpu.dot_dimension_numbers<[1], [0], [0], [1], [0, 0, 1, 1], [], []>} : vector<16x32xbf16>, vector<32x128xbf16>, vector<16x128xf32> -> vector<16x128xf32>
    %c0_3 = arith.constant 0 : index
    %c0_4 = arith.constant 0 : index
    %3 = vector.load %arg3[%c0_3, %c0_4] : memref<1x128xf32, #tpu.memory_space<vmem>>, vector<1x128xf32>
    %4 = vector.broadcast %3 : vector<1x128xf32> to vector<16x128xf32>
    %5 = arith.addf %2, %4 : vector<16x128xf32>
    %c0_5 = arith.constant 0 : index
    %c0_6 = arith.constant 0 : index
    %6 = vector.load %arg4[%c0_5, %c0_6] : memref<16x128xf32, #tpu.memory_space<vmem>>, vector<16x128xf32>
    tpu.vector_store %arg4[%c0_5, %c0_6], %5 {strides = array<i32>} : memref<16x128xf32, #tpu.memory_space<vmem>>, vector<16x128xf32>,
    return
  }
  func.func @transform_0(%arg0: i32) -> (i32, i32) {
    %c0_i32 = arith.constant 0 : i32
    %c0_i32_0 = arith.constant 0 : i32
    return %arg0, %c0_i32 : i32, i32
  }
  func.func @transform_1(%arg0: i32) -> (i32, i32) {
    %c0_i32 = arith.constant 0 : i32
    %c0_i32_0 = arith.constant 0 : i32
    %c0_i32_1 = arith.constant 0 : i32
    return %c0_i32, %c0_i32_0 : i32, i32
  }
  func.func @transform_2(%arg0: i32) -> (i32, i32) {
    %c0_i32 = arith.constant 0 : i32
    %c0_i32_0 = arith.constant 0 : i32
    %c0_i32_1 = arith.constant 0 : i32
    return %c0_i32, %c0_i32_0 : i32, i32
  }
  func.func @transform_3(%arg0: i32) -> (i32, i32) {
    %c0_i32 = arith.constant 0 : i32
    %c0_i32_0 = arith.constant 0 : i32
    return %arg0, %c0_i32 : i32, i32
  }
}

</mosaic_0001>

<bundles_post_ra>
// kernel: gcn_net_forward.4
= control target key start
LH: loop header
LB: loop body
LE: loop exit
PB: predicated region body
PF: predicated region fallthrough
CT: control target
= control target key end

     0   :  { %s573_s15 = smov 0   ;;  %s654_s0 = inlined_call_operand.vmem [shape: bf16[32,32], index: 0, kind: input, shape index: {}]   ;;  %s655_s1 = inlined_call_operand.vmem [shape: bf16[32,128], index: 1, kind: input, shape index: {}]   ;;  %s656_s2 = inlined_call_operand.vmem [shape: f32[1,128], index: 2, kind: input, shape index: {}]   ;;  %s657_s3 = inlined_call_operand.vmem [shape: f32[128,128], index: 3, kind: input, shape index: {}]   ;;  %s658_s4 = inlined_call_operand.vmem [shape: bf16[32,128], index: 4, kind: output, shape index: {}]  }
   0x1 LB: > { %s436_s16 = sadd.s32 4294967295, %s544_s15   ;;  %p440_p0 = scmp.ge.s32.totalorder %s544_s15, 1  ;;  %s544_s15 = sphi %s573_s15, %s14_s15  }
   0x2   : > { %p163_p1 = scmp.lt.s32.totalorder %s544_s15, 3 }
   0x4   : > { %p164_p2 = pnand %p440_p0, %p163_p1 }
   0x5   : > { %s441_s21 = sshll.u32 (!%p164_p2), %s436_s16, 1 }
   0x6   : > { %167 = sbr.rel (%p164_p2) target bundleno = 419 (0x1a3), region = 36  ;;  %p190_p3 = scmp.lt.s32.totalorder (!%p164_p2), %s441_s21, 3 }
   0xb   : > { %v535_v0 = vld [vmem:[%s655_s1 + $0x8] sm:$0xff]   ;;  %v546_v1 = vmov 0.0   ;;  %v536_v2 = vld [vmem:[%s655_s1] sm:$0xff]   ;;  %vm547_vm0 = vmmov 0   ;;  %v294_v3 = vld [vmem:[%s657_s3 + $0x78] sm:$0xff]  ;;  %s660_s21 = smov (!%p190_p3, %s441_s21), 3 }
   0xc   : > { %482 = vmatprep.subr.bf16.mxu0 %v546_v1  ;;  %486 = vmatprep.mubr.msk.bf16.mxu0 %vm547_vm0, %v546_v1  ;;  %v293_v4 = vld [vmem:[%s657_s3 + $0x70] sm:$0xff]  ;;  %v292_v5 = vld [vmem:[%s657_s3 + $0x68] sm:$0xff]  ;;  %v291_v6 = vld [vmem:[%s657_s3 + $0x60] sm:$0xff]  ;;  %s442_s30 = sshll.u32 %s660_s21, 2  ;;  %vm232_vm1 = vcmask 261120  }
   0xd   : > { %483 = vmatpush3.bf16.msra.mxu0 %v535_v0  ;;  %490 = vmatprep.subr.mxu1 %v294_v3  ;;  %s193_s7 = scalar_lea.vmem %s654_s0, %s442_s30  ;;  %v290_v7 = vld [vmem:[%s657_s3 + $0x58] sm:$0xff]  ;;  %v289_v9 = vld [vmem:[%s657_s3 + $0x50] sm:$0xff]  ;;  %v288_v10 = vld [vmem:[%s657_s3 + $0x48] sm:$0xff]  ;;  %s199_s13 = scalar_lea.vmem %s658_s4, %s442_s30 }
   0xe   : > { %484 = vmatprep.subr.bf16.mxu0 %v546_v1  ;;  %491 = vmatpush3.msra.mxu1 %v294_v3  ;;  %v537_v8 = vld [vmem:[%s193_s7] sm:$0xff]   ;;  %v286_v12 = vld [vmem:[%s657_s3 + $0x38] sm:$0xff]  ;;  %v285_v13 = vld [vmem:[%s657_s3 + $0x30] sm:$0xff] }
   0xf   : > { %492 = vmatprep.subr.mxu1 %v293_v4  ;;  %v287_v11 = vld [vmem:[%s657_s3 + $0x40] sm:$0xff]  ;;  %v284_v14 = vld [vmem:[%s657_s3 + $0x28] sm:$0xff]  ;;  %v282_v16 = vld [vmem:[%s657_s3 + $0x18] sm:$0xff] }
  0x10   : > { %493 = vmatpush3.msra.mxu1 %v293_v4  ;;  %v283_v15 = vld [vmem:[%s657_s3 + $0x20] sm:$0xff]  ;;  %v281_v17 = vld [vmem:[%s657_s3 + $0x10] sm:$0xff]  ;;  %v280_v18 = vld [vmem:[%s657_s3 + $0x8] sm:$0xff] }
  0x11   : > { %485 = vmatpush3.bf16.msra.mxu0 %v536_v2  ;;  %494 = vmatprep.subr.mxu1 %v292_v5  ;;  %v279_v19 = vld [vmem:[%s657_s3] sm:$0xff] }
  0x12   : > { %495 = vmatpush3.msra.mxu1 %v292_v5  ;;  %v445_v20 = vld [vmem:[%s656_s2] ss:$0 sm:$0xff] }
  0x13   : > { %496 = vmatprep.subr.mxu1 %v291_v6 }
  0x14   : > { %497 = vmatpush3.msra.mxu1 %v291_v6  ;;  %487 = vmatmul.mubr.msk.bf16.vlgmr.msra.gmra.mxu0 %vm232_vm1, %v537_v8 }
  0x15   : > { %498 = vmatprep.subr.mxu1 %v290_v7 }
  0x16   : > { %499 = vmatpush3.msra.mxu1 %v290_v7 }
  0x17   : > { %500 = vmatprep.subr.mxu1 %v289_v9 }
  0x18   : > { %501 = vmatpush3.msra.mxu1 %v289_v9 }
  0x19   : > { %502 = vmatprep.subr.mxu1 %v288_v10 }
  0x1a   : > { %503 = vmatpush3.msra.mxu1 %v288_v10 }
  0x1b   : > { %504 = vmatprep.subr.mxu1 %v287_v11 }
  0x1c   : > { %505 = vmatpush3.msra.mxu1 %v287_v11 }
  0x1d   : > { %506 = vmatprep.subr.mxu1 %v286_v12 }
  0x1e   : > { %507 = vmatpush3.msra.mxu1 %v286_v12 }
  0x1f   : > { %508 = vmatprep.subr.mxu1 %v285_v13 }
  0x20   : > { %509 = vmatpush3.msra.mxu1 %v285_v13 }
  0x21   : > { %510 = vmatprep.subr.mxu1 %v284_v14 }
  0x22   : > { %511 = vmatpush3.msra.mxu1 %v284_v14 }
  0x23   : > { %512 = vmatprep.subr.mxu1 %v283_v15 }
  0x24   : > { %513 = vmatpush3.msra.mxu1 %v283_v15 }
  0x25   : > { %514 = vmatprep.subr.mxu1 %v282_v16 }
  0x26   : > { %515 = vmatpush3.msra.mxu1 %v282_v16 }
  0x27   : > { %516 = vmatprep.subr.mxu1 %v281_v17 }
  0x28   : > { %517 = vmatpush3.msra.mxu1 %v281_v17 }
  0x29   : > { %518 = vmatprep.subr.mxu1 %v280_v18 }
  0x2a   : > { %519 = vmatpush3.msra.mxu1 %v280_v18 }
  0x2b   : > { %520 = vmatprep.subr.mxu1 %v279_v19 }
  0x2c   : > { %521 = vmatpush3.msra.mxu1 %v279_v19 }
  0xd4   : > { %v270_v21 = vpop.f32.mrf.mxu0 }
  0xd5   : > { %v271_v22 = vadd.f32 %v445_v20, %v270_v21 }
  0xd6   : > { %v488_v23 = vpop.f32.mrf.mxu0 }
  0xd7   : > { %v277_v24 = vmax.f32 %v271_v22, 0.0 }
  0xd8   : > { %v273_v25 = vpop.f32.mrf.mxu0 }
  0xd9   : > { %v274_v26 = vadd.f32 %v445_v20, %v273_v25  ;;  %522 = vmatprep.mubr.f32.mxu1 %v277_v24 }
  0xda   : > { %v489_v27 = vpop.f32.mrf.mxu0 }
  0xdb   : > { %v278_v28 = vmax.f32 %v274_v26, 0.0 }
  0xdd   : > { %523 = vmatmul.mubr.f32.vlgmr.msra.gmra.mxu1 %v278_v28 }
 0x19d   : > { %v524_v29 = vpop.f32.mrf.mxu1 }
 0x19f   : > { %v361_v30 = vpop.f32.mrf.mxu1 }
 0x1a0   : > { %v459_v31 = vpack.c.bf16 %v524_v29, %v361_v30 }
 0x1a2   : > { %460 = vst [vmem:[%s199_s13] sm:$0xff] %v459_v31  }
 0x1a3 PF: > { %s14_s15 = sadd.s32 1, %s544_s15  }
 0x1a4   : > { %p11_p4 = scmp.ge.s32.totalorder %s14_s15, 4  }
 0x1a6   :  { %13 = sbr.rel (!%p11_p4) target bundleno = 1 (0x1), region = 66 }

// kernel: gcn_net_forward.5
= control target key start
LH: loop header
LB: loop body
LE: loop exit
PB: predicated region body
PF: predicated region fallthrough
CT: control target
= control target key end

     0   :  { %s378_s12 = smov 0   ;;  %s404_s0 = inlined_call_operand.vmem [shape: bf16[32,32], index: 0, kind: input, shape index: {}]   ;;  %s405_s1 = inlined_call_operand.vmem [shape: bf16[32,128], index: 1, kind: input, shape index: {}]   ;;  %s406_s2 = inlined_call_operand.vmem [shape: f32[1,128], index: 2, kind: input, shape index: {}]   ;;  %s407_s3 = inlined_call_operand.vmem [shape: f32[32,128], index: 3, kind: output, shape index: {}]  }
   0x1 LB: > { %s308_s13 = sadd.s32 4294967295, %s354_s12   ;;  %p312_p0 = scmp.ge.s32.totalorder %s354_s12, 1  ;;  %s354_s12 = sphi %s378_s12, %s13_s12  }
   0x2   : > { %p138_p1 = scmp.lt.s32.totalorder %s354_s12, 3 }
   0x4   : > { %p139_p2 = pnand %p312_p0, %p138_p1 }
   0x5   : > { %s313_s18 = sshll.u32 (!%p139_p2), %s308_s13, 1 }
   0x6   : > { %142 = sbr.rel (%p139_p2) target bundleno = 220 (0xdc), region = 32  ;;  %p163_p3 = scmp.lt.s32.totalorder (!%p139_p2), %s313_s18, 3 }
   0xb   : > { %v345_v0 = vld [vmem:[%s405_s1 + $0x8] sm:$0xff]   ;;  %v356_v1 = vmov 0.0   ;;  %v346_v2 = vld [vmem:[%s405_s1] sm:$0xff]   ;;  %vm357_vm0 = vmmov 0   ;;  %s409_s18 = smov (!%p163_p3, %s313_s18), 3  ;;  %vm205_vm1 = vcmask 261120  }
   0xc   : > { %327 = vmatprep.subr.bf16.mxu0 %v356_v1  ;;  %331 = vmatprep.mubr.msk.bf16.mxu0 %vm357_vm0, %v356_v1  ;;  %s314_s19 = sshll.u32 %s409_s18, 2  ;;  %s316_s23 = sshll.u32 %s409_s18, 3  ;;  %v317_v4 = vld [vmem:[%s406_s2] ss:$0 sm:$0xff] }
   0xd   : > { %328 = vmatpush3.bf16.msra.mxu0 %v345_v0  ;;  %s166_s22 = scalar_lea.vmem %s404_s0, %s314_s19  ;;  %s172_s28 = scalar_lea.vmem %s407_s3, %s316_s23 }
   0xe   : > { %329 = vmatprep.subr.bf16.mxu0 %v356_v1  ;;  %v347_v3 = vld [vmem:[%s166_s22] sm:$0xff]  }
  0x11   : > { %330 = vmatpush3.bf16.msra.mxu0 %v346_v2 }
  0x14   : > { %332 = vmatmul.mubr.msk.bf16.vlgmr.msra.gmra.mxu0 %vm205_vm1, %v347_v3 }
  0xd4   : > { %v243_v5 = vpop.f32.mrf.mxu0 }
  0xd5   : > { %v244_v6 = vadd.f32 %v317_v4, %v243_v5 }
  0xd6   : > { %v333_v7 = vpop.f32.mrf.mxu0 }
  0xd7   : > { %250 = vst [vmem:[%s172_s28] sm:$0xff] %v244_v6 }
  0xd8   : > { %v246_v8 = vpop.f32.mrf.mxu0 }
  0xd9   : > { %v247_v9 = vadd.f32 %v317_v4, %v246_v8 }
  0xda   : > { %v334_v10 = vpop.f32.mrf.mxu0 }
  0xdb   : > { %251 = vst [vmem:[%s172_s28 + $0x8] sm:$0xff] %v247_v9 }
  0xdc PF: > { %s13_s12 = sadd.s32 1, %s354_s12  }
  0xdd   : > { %p10_p4 = scmp.ge.s32.totalorder %s13_s12, 4  }
  0xdf   :  { %12 = sbr.rel (!%p10_p4) target bundleno = 1 (0x1), region = 62 }

// kernel: gcn_net_forward.3
= control target key start
LH: loop header
LB: loop body
LE: loop exit
PB: predicated region body
PF: predicated region fallthrough
CT: control target
= control target key end

     0   :  { %s1162_s9 = smov 0   ;;  %s1793_s0 = inlined_call_operand.vmem [shape: f32[32,1536], index: 0, kind: input, shape index: {}]   ;;  %s1794_s1 = inlined_call_operand.vmem [shape: f32[1536,128], index: 1, kind: input, shape index: {}]   ;;  %s1795_s2 = inlined_call_operand.vmem [shape: bf16[32,128], index: 2, kind: output, shape index: {}]  }
   0x1 LB: > { %s882_s10 = sadd.s32 4294967295, %s1145_s9   ;;  %p886_p0 = scmp.ge.s32.totalorder %s1145_s9, 1  ;;  %s1145_s9 = sphi %s1162_s9, %s12_s9  }
   0x2   : > { %p114_p1 = scmp.lt.s32.totalorder %s1145_s9, 3 }
   0x4   : > { %p115_p2 = pnand %p886_p0, %p114_p1 }
   0x5   : > { %s1256_s15 = sshll.u32 (!%p115_p2), %s882_s10, 1 }
   0x6   : > { %118 = sbr.rel (%p115_p2) target bundleno = 326 (0x146), region = 28  ;;  %p138_p3 = scmp.lt.s32.totalorder (!%p115_p2), %s1256_s15, 3 }
   0xb   : > { %v205_v0 = vld [vmem:[%s1794_s1 + $0xf8] sm:$0xff]  ;;  %v204_v4 = vld [vmem:[%s1794_s1 + $0xf0] sm:$0xff]  ;;  %v203_v8 = vld [vmem:[%s1794_s1 + $0xe8] sm:$0xff]  ;;  %s1797_s15 = smov (!%p138_p3, %s1256_s15), 3 }
   0xc   : > { %v237_v1 = vld [vmem:[%s1794_s1 + $0x1f8] sm:$0xff]  ;;  %902 = vmatprep.subr.mxu0 %v205_v0  ;;  %v236_v5 = vld [vmem:[%s1794_s1 + $0x1f0] sm:$0xff]  ;;  %v235_v9 = vld [vmem:[%s1794_s1 + $0x1e8] sm:$0xff]  ;;  %s1130_s5 = smul.u32 96, %s1797_s15 }
   0xd   : > { %v189_v2 = vld [vmem:[%s1794_s1 + $0x78] sm:$0xff]  ;;  %940 = vmatprep.subr.mxu1 %v237_v1  ;;  %v188_v6 = vld [vmem:[%s1794_s1 + $0x70] sm:$0xff]  ;;  %v187_v10 = vld [vmem:[%s1794_s1 + $0x68] sm:$0xff] }
   0xe   : > { %v221_v3 = vld [vmem:[%s1794_s1 + $0x178] sm:$0xff]  ;;  %903 = vmatpush3.msra.mxu0 %v189_v2  ;;  %v220_v7 = vld [vmem:[%s1794_s1 + $0x170] sm:$0xff]  ;;  %v219_v11 = vld [vmem:[%s1794_s1 + $0x168] sm:$0xff]  ;;  %s1358_s26 = scalar_lea.vmem %s1793_s0, %s1130_s5 }
   0xf   : > { %941 = vmatpush3.msra.mxu1 %v221_v3  ;;  %904 = vmatprep.subr.mxu0 %v204_v4  ;;  %v202_v12 = vld [vmem:[%s1794_s1 + $0xe0] sm:$0xff]  ;;  %v201_v16 = vld [vmem:[%s1794_s1 + $0xd8] sm:$0xff]  ;;  %v200_v20 = vld [vmem:[%s1794_s1 + $0xd0] sm:$0xff] }
  0x10   : > { %942 = vmatprep.subr.mxu1 %v236_v5  ;;  %905 = vmatpush3.msra.mxu0 %v188_v6  ;;  %v234_v13 = vld [vmem:[%s1794_s1 + $0x1e0] sm:$0xff]  ;;  %v233_v17 = vld [vmem:[%s1794_s1 + $0x1d8] sm:$0xff]  ;;  %v232_v21 = vld [vmem:[%s1794_s1 + $0x1d0] sm:$0xff] }
  0x11   : > { %943 = vmatpush3.msra.mxu1 %v220_v7  ;;  %906 = vmatprep.subr.mxu0 %v203_v8  ;;  %v186_v14 = vld [vmem:[%s1794_s1 + $0x60] sm:$0xff]  ;;  %v185_v18 = vld [vmem:[%s1794_s1 + $0x58] sm:$0xff]  ;;  %v184_v22 = vld [vmem:[%s1794_s1 + $0x50] sm:$0xff] }
  0x12   : > { %944 = vmatprep.subr.mxu1 %v235_v9  ;;  %v218_v15 = vld [vmem:[%s1794_s1 + $0x160] sm:$0xff]  ;;  %907 = vmatpush3.msra.mxu0 %v187_v10  ;;  %v217_v19 = vld [vmem:[%s1794_s1 + $0x158] sm:$0xff]  ;;  %v216_v23 = vld [vmem:[%s1794_s1 + $0x150] sm:$0xff] }
  0x13   : > { %945 = vmatpush3.msra.mxu1 %v219_v11  ;;  %908 = vmatprep.subr.mxu0 %v202_v12  ;;  %v199_v24 = vld [vmem:[%s1794_s1 + $0xc8] sm:$0xff]  ;;  %v198_v28 = vld [vmem:[%s1794_s1 + $0xc0] sm:$0xff]  ;;  %v197_v32 = vld [vmem:[%s1794_s1 + $0xb8] sm:$0xff] }
  0x14   : > { %946 = vmatprep.subr.mxu1 %v234_v13  ;;  %909 = vmatpush3.msra.mxu0 %v186_v14  ;;  %v231_v25 = vld [vmem:[%s1794_s1 + $0x1c8] sm:$0xff]  ;;  %v230_v29 = vld [vmem:[%s1794_s1 + $0x1c0] sm:$0xff]  ;;  %v229_v33 = vld [vmem:[%s1794_s1 + $0x1b8] sm:$0xff] }
  0x15   : > { %947 = vmatpush3.msra.mxu1 %v218_v15  ;;  %910 = vmatprep.subr.mxu0 %v201_v16  ;;  %v183_v26 = vld [vmem:[%s1794_s1 + $0x48] sm:$0xff]  ;;  %v182_v30 = vld [vmem:[%s1794_s1 + $0x40] sm:$0xff]  ;;  %v181_v34 = vld [vmem:[%s1794_s1 + $0x38] sm:$0xff] }
  0x16   : > { %948 = vmatprep.subr.mxu1 %v233_v17  ;;  %911 = vmatpush3.msra.mxu0 %v185_v18  ;;  %v215_v27 = vld [vmem:[%s1794_s1 + $0x148] sm:$0xff]  ;;  %v214_v31 = vld [vmem:[%s1794_s1 + $0x140] sm:$0xff]  ;;  %v213_v35 = vld [vmem:[%s1794_s1 + $0x138] sm:$0xff] }
  0x17   : > { %949 = vmatpush3.msra.mxu1 %v217_v19  ;;  %912 = vmatprep.subr.mxu0 %v200_v20  ;;  %v196_v36 = vld [vmem:[%s1794_s1 + $0xb0] sm:$0xff]  ;;  %v195_v40 = vld [vmem:[%s1794_s1 + $0xa8] sm:$0xff]  ;;  %v194_v44 = vld [vmem:[%s1794_s1 + $0xa0] sm:$0xff] }
  0x18   : > { %950 = vmatprep.subr.mxu1 %v232_v21  ;;  %913 = vmatpush3.msra.mxu0 %v184_v22  ;;  %v228_v37 = vld [vmem:[%s1794_s1 + $0x1b0] sm:$0xff]  ;;  %v227_v41 = vld [vmem:[%s1794_s1 + $0x1a8] sm:$0xff]  ;;  %v226_v45 = vld [vmem:[%s1794_s1 + $0x1a0] sm:$0xff] }
  0x19   : > { %951 = vmatpush3.msra.mxu1 %v216_v23  ;;  %914 = vmatprep.subr.mxu0 %v199_v24  ;;  %v180_v38 = vld [vmem:[%s1794_s1 + $0x30] sm:$0xff]  ;;  %v179_v42 = vld [vmem:[%s1794_s1 + $0x28] sm:$0xff]  ;;  %v178_v46 = vld [vmem:[%s1794_s1 + $0x20] sm:$0xff] }
  0x1a   : > { %952 = vmatprep.subr.mxu1 %v231_v25  ;;  %915 = vmatpush3.msra.mxu0 %v183_v26  ;;  %v212_v39 = vld [vmem:[%s1794_s1 + $0x130] sm:$0xff]  ;;  %v211_v43 = vld [vmem:[%s1794_s1 + $0x128] sm:$0xff]  ;;  %v210_v47 = vld [vmem:[%s1794_s1 + $0x120] sm:$0xff] }
  0x1b   : > { %953 = vmatpush3.msra.mxu1 %v215_v27  ;;  %916 = vmatprep.subr.mxu0 %v198_v28  ;;  %v193_v48 = vld [vmem:[%s1794_s1 + $0x98] sm:$0xff]  ;;  %v192_v52 = vld [vmem:[%s1794_s1 + $0x90] sm:$0xff]  ;;  %v191_v56 = vld [vmem:[%s1794_s1 + $0x88] sm:$0xff] }
  0x1c   : > { %954 = vmatprep.subr.mxu1 %v230_v29  ;;  %917 = vmatpush3.msra.mxu0 %v182_v30  ;;  %v225_v49 = vld [vmem:[%s1794_s1 + $0x198] sm:$0xff]  ;;  %v224_v53 = vld [vmem:[%s1794_s1 + $0x190] sm:$0xff]  ;;  %v223_v57 = vld [vmem:[%s1794_s1 + $0x188] sm:$0xff] }
  0x1d   : > { %955 = vmatpush3.msra.mxu1 %v214_v31  ;;  %918 = vmatprep.subr.mxu0 %v197_v32  ;;  %v177_v50 = vld [vmem:[%s1794_s1 + $0x18] sm:$0xff]  ;;  %v176_v54 = vld [vmem:[%s1794_s1 + $0x10] sm:$0xff]  ;;  %v175_v58 = vld [vmem:[%s1794_s1 + $0x8] sm:$0xff] }
  0x1e   : > { %956 = vmatprep.subr.mxu1 %v229_v33  ;;  %919 = vmatpush3.msra.mxu0 %v181_v34  ;;  %v209_v51 = vld [vmem:[%s1794_s1 + $0x118] sm:$0xff]  ;;  %v208_v55 = vld [vmem:[%s1794_s1 + $0x110] sm:$0xff]  ;;  %v207_v59 = vld [vmem:[%s1794_s1 + $0x108] sm:$0xff] }
  0x1f   : > { %957 = vmatpush3.msra.mxu1 %v213_v35  ;;  %920 = vmatprep.subr.mxu0 %v196_v36  ;;  %v190_v60 = vld [vmem:[%s1794_s1 + $0x80] sm:$0xff]  ;;  %v151_v63 = vld [vmem:[%s1358_s26 + $0x8] sm:$0xff]  ;;  %v153_v1 = vld [vmem:[%s1358_s26 + $0x18] sm:$0xff] }
  0x20   : > { %958 = vmatprep.subr.mxu1 %v228_v37  ;;  %921 = vmatpush3.msra.mxu0 %v180_v38  ;;  %v222_v61 = vld [vmem:[%s1794_s1 + $0x180] sm:$0xff]  ;;  %v152_v3 = vld [vmem:[%s1358_s26 + $0x10] sm:$0xff]  ;;  %v269_v4 = vld [vmem:[%s1794_s1 + $0x2f8] sm:$0xff] }
  0x21   : > { %959 = vmatpush3.msra.mxu1 %v212_v39  ;;  %922 = vmatprep.subr.mxu0 %v195_v40  ;;  %v174_v62 = vld [vmem:[%s1794_s1] sm:$0xff]  ;;  %v301_v5 = vld [vmem:[%s1794_s1 + $0x3f8] sm:$0xff]  ;;  %v268_v8 = vld [vmem:[%s1794_s1 + $0x2f0] sm:$0xff] }
  0x22   : > { %960 = vmatprep.subr.mxu1 %v227_v41  ;;  %923 = vmatpush3.msra.mxu0 %v179_v42  ;;  %v206_v0 = vld [vmem:[%s1794_s1 + $0x100] sm:$0xff]  ;;  %v253_v6 = vld [vmem:[%s1794_s1 + $0x278] sm:$0xff]  ;;  %v300_v9 = vld [vmem:[%s1794_s1 + $0x3f0] sm:$0xff] }
  0x23   : > { %961 = vmatpush3.msra.mxu1 %v211_v43  ;;  %924 = vmatprep.subr.mxu0 %v194_v44  ;;  %v150_v2 = vld [vmem:[%s1358_s26] sm:$0xff]  ;;  %v285_v7 = vld [vmem:[%s1794_s1 + $0x378] sm:$0xff]  ;;  %v252_v10 = vld [vmem:[%s1794_s1 + $0x270] sm:$0xff] }
  0x24   : > { %962 = vmatprep.subr.mxu1 %v226_v45  ;;  %925 = vmatpush3.msra.mxu0 %v178_v46  ;;  %v284_v11 = vld [vmem:[%s1794_s1 + $0x370] sm:$0xff]  ;;  %v267_v12 = vld [vmem:[%s1794_s1 + $0x2e8] sm:$0xff]  ;;  %v266_v16 = vld [vmem:[%s1794_s1 + $0x2e0] sm:$0xff] }
  0x25   : > { %963 = vmatpush3.msra.mxu1 %v210_v47  ;;  %926 = vmatprep.subr.mxu0 %v193_v48  ;;  %v299_v13 = vld [vmem:[%s1794_s1 + $0x3e8] sm:$0xff]  ;;  %v298_v17 = vld [vmem:[%s1794_s1 + $0x3e0] sm:$0xff]  ;;  %v265_v20 = vld [vmem:[%s1794_s1 + $0x2d8] sm:$0xff] }
  0x26   : > { %964 = vmatprep.subr.mxu1 %v225_v49  ;;  %927 = vmatpush3.msra.mxu0 %v177_v50  ;;  %v251_v14 = vld [vmem:[%s1794_s1 + $0x268] sm:$0xff]  ;;  %v250_v18 = vld [vmem:[%s1794_s1 + $0x260] sm:$0xff]  ;;  %v297_v21 = vld [vmem:[%s1794_s1 + $0x3d8] sm:$0xff] }
  0x27   : > { %965 = vmatpush3.msra.mxu1 %v209_v51  ;;  %928 = vmatprep.subr.mxu0 %v192_v52  ;;  %v283_v15 = vld [vmem:[%s1794_s1 + $0x368] sm:$0xff]  ;;  %v282_v19 = vld [vmem:[%s1794_s1 + $0x360] sm:$0xff]  ;;  %v249_v22 = vld [vmem:[%s1794_s1 + $0x258] sm:$0xff] }
  0x28   : > { %966 = vmatprep.subr.mxu1 %v224_v53  ;;  %929 = vmatpush3.msra.mxu0 %v176_v54  ;;  %v281_v23 = vld [vmem:[%s1794_s1 + $0x358] sm:$0xff]  ;;  %v264_v24 = vld [vmem:[%s1794_s1 + $0x2d0] sm:$0xff]  ;;  %v263_v28 = vld [vmem:[%s1794_s1 + $0x2c8] sm:$0xff] }
  0x29   : > { %967 = vmatpush3.msra.mxu1 %v208_v55  ;;  %930 = vmatprep.subr.mxu0 %v191_v56  ;;  %v296_v25 = vld [vmem:[%s1794_s1 + $0x3d0] sm:$0xff]  ;;  %v295_v29 = vld [vmem:[%s1794_s1 + $0x3c8] sm:$0xff]  ;;  %v262_v32 = vld [vmem:[%s1794_s1 + $0x2c0] sm:$0xff] }
  0x2a   : > { %968 = vmatprep.subr.mxu1 %v223_v57  ;;  %931 = vmatpush3.msra.mxu0 %v175_v58  ;;  %v248_v26 = vld [vmem:[%s1794_s1 + $0x250] sm:$0xff]  ;;  %v247_v30 = vld [vmem:[%s1794_s1 + $0x248] sm:$0xff]  ;;  %v294_v33 = vld [vmem:[%s1794_s1 + $0x3c0] sm:$0xff] }
  0x2b   : > { %969 = vmatpush3.msra.mxu1 %v207_v59  ;;  %932 = vmatprep.subr.mxu0 %v190_v60  ;;  %v280_v27 = vld [vmem:[%s1794_s1 + $0x350] sm:$0xff]  ;;  %v279_v31 = vld [vmem:[%s1794_s1 + $0x348] sm:$0xff]  ;;  %v246_v34 = vld [vmem:[%s1794_s1 + $0x240] sm:$0xff] }
  0x2c   : > { %970 = vmatprep.subr.mxu1 %v222_v61  ;;  %933 = vmatpush3.msra.mxu0 %v174_v62  ;;  %v278_v35 = vld [vmem:[%s1794_s1 + $0x340] sm:$0xff]  ;;  %v261_v36 = vld [vmem:[%s1794_s1 + $0x2b8] sm:$0xff]  ;;  %v260_v40 = vld [vmem:[%s1794_s1 + $0x2b0] sm:$0xff] }
  0x2d   : > { %430 = vmatprep.mubr.f32.mxu0 %v151_v63  ;;  %971 = vmatpush3.msra.mxu1 %v206_v0  ;;  %v293_v37 = vld [vmem:[%s1794_s1 + $0x3b8] sm:$0xff]  ;;  %v292_v41 = vld [vmem:[%s1794_s1 + $0x3b0] sm:$0xff]  ;;  %v259_v44 = vld [vmem:[%s1794_s1 + $0x2a8] sm:$0xff] }
  0x2e   : > { %505 = vmatprep.mubr.f32.mxu1 %v153_v1  ;;  %431 = vmatmul.mubr.f32.vlgmr.msra.gmra.mxu0 %v150_v2  ;;  %v245_v38 = vld [vmem:[%s1794_s1 + $0x238] sm:$0xff]  ;;  %v244_v42 = vld [vmem:[%s1794_s1 + $0x230] sm:$0xff]  ;;  %v291_v45 = vld [vmem:[%s1794_s1 + $0x3a8] sm:$0xff] }
  0x2f   : > { %506 = vmatmul.mubr.f32.vlgmr.msra.gmra.mxu1 %v152_v3  ;;  %978 = vmatprep.subr.mxu0 %v269_v4  ;;  %v277_v39 = vld [vmem:[%s1794_s1 + $0x338] sm:$0xff]  ;;  %v276_v43 = vld [vmem:[%s1794_s1 + $0x330] sm:$0xff]  ;;  %v243_v46 = vld [vmem:[%s1794_s1 + $0x228] sm:$0xff] }
  0x30   : > { %1016 = vmatprep.subr.mxu1 %v301_v5  ;;  %979 = vmatpush3.msra.mxu0 %v253_v6  ;;  %v275_v47 = vld [vmem:[%s1794_s1 + $0x328] sm:$0xff]  ;;  %v258_v48 = vld [vmem:[%s1794_s1 + $0x2a0] sm:$0xff]  ;;  %v257_v52 = vld [vmem:[%s1794_s1 + $0x298] sm:$0xff] }
  0x31   : > { %1017 = vmatpush3.msra.mxu1 %v285_v7  ;;  %980 = vmatprep.subr.mxu0 %v268_v8  ;;  %v290_v49 = vld [vmem:[%s1794_s1 + $0x3a0] sm:$0xff]  ;;  %v289_v53 = vld [vmem:[%s1794_s1 + $0x398] sm:$0xff]  ;;  %v163_v56 = vld [vmem:[%s1358_s26 + $0x68] sm:$0xff] }
  0x32   : > { %1018 = vmatprep.subr.mxu1 %v300_v9  ;;  %981 = vmatpush3.msra.mxu0 %v252_v10  ;;  %v242_v50 = vld [vmem:[%s1794_s1 + $0x220] sm:$0xff]  ;;  %v241_v54 = vld [vmem:[%s1794_s1 + $0x218] sm:$0xff]  ;;  %v256_v58 = vld [vmem:[%s1794_s1 + $0x290] sm:$0xff] }
  0x33   : > { %1019 = vmatpush3.msra.mxu1 %v284_v11  ;;  %982 = vmatprep.subr.mxu0 %v267_v12  ;;  %v274_v51 = vld [vmem:[%s1794_s1 + $0x320] sm:$0xff]  ;;  %v273_v55 = vld [vmem:[%s1794_s1 + $0x318] sm:$0xff]  ;;  %v288_v59 = vld [vmem:[%s1794_s1 + $0x390] sm:$0xff] }
  0x34   : > { %1020 = vmatprep.subr.mxu1 %v299_v13  ;;  %983 = vmatpush3.msra.mxu0 %v251_v14  ;;  %v165_v57 = vld [vmem:[%s1358_s26 + $0x78] sm:$0xff]  ;;  %v162_v60 = vld [vmem:[%s1358_s26 + $0x60] sm:$0xff]  ;;  %v164_v61 = vld [vmem:[%s1358_s26 + $0x70] sm:$0xff] }
  0x35   : > { %1021 = vmatpush3.msra.mxu1 %v283_v15  ;;  %984 = vmatprep.subr.mxu0 %v266_v16  ;;  %v240_v62 = vld [vmem:[%s1794_s1 + $0x210] sm:$0xff]  ;;  %v255_v0 = vld [vmem:[%s1794_s1 + $0x288] sm:$0xff]  ;;  %v254_v4 = vld [vmem:[%s1794_s1 + $0x280] sm:$0xff] }
  0x36   : > { %1022 = vmatprep.subr.mxu1 %v298_v17  ;;  %985 = vmatpush3.msra.mxu0 %v250_v18  ;;  %v272_v63 = vld [vmem:[%s1794_s1 + $0x310] sm:$0xff]  ;;  %v287_v1 = vld [vmem:[%s1794_s1 + $0x388] sm:$0xff]  ;;  %v286_v5 = vld [vmem:[%s1794_s1 + $0x380] sm:$0xff] }
  0x37   : > { %1023 = vmatpush3.msra.mxu1 %v282_v19  ;;  %986 = vmatprep.subr.mxu0 %v265_v20  ;;  %v239_v2 = vld [vmem:[%s1794_s1 + $0x208] sm:$0xff]  ;;  %v238_v6 = vld [vmem:[%s1794_s1 + $0x200] sm:$0xff]  ;;  %v157_v10 = vld [vmem:[%s1358_s26 + $0x38] sm:$0xff] }
  0x38   : > { %1024 = vmatprep.subr.mxu1 %v297_v21  ;;  %987 = vmatpush3.msra.mxu0 %v249_v22  ;;  %v271_v3 = vld [vmem:[%s1794_s1 + $0x308] sm:$0xff]  ;;  %v270_v8 = vld [vmem:[%s1794_s1 + $0x300] sm:$0xff]  ;;  %v333_v11 = vld [vmem:[%s1794_s1 + $0x4f8] sm:$0xff] }
  0x39   : > { %1025 = vmatpush3.msra.mxu1 %v281_v23  ;;  %988 = vmatprep.subr.mxu0 %v264_v24  ;;  %v155_v7 = vld [vmem:[%s1358_s26 + $0x28] sm:$0xff]  ;;  %v154_v9 = vld [vmem:[%s1358_s26 + $0x20] sm:$0xff]  ;;  %v365_v12 = vld [vmem:[%s1794_s1 + $0x5f8] sm:$0xff] }
  0x3a   : > { %1026 = vmatprep.subr.mxu1 %v296_v25  ;;  %989 = vmatpush3.msra.mxu0 %v248_v26  ;;  %v156_v13 = vld [vmem:[%s1358_s26 + $0x30] sm:$0xff]  ;;  %v317_v14 = vld [vmem:[%s1794_s1 + $0x478] sm:$0xff]  ;;  %v167_v18 = vld [vmem:[%s1358_s26 + $0x88] sm:$0xff] }
  0x3b   : > { %1027 = vmatpush3.msra.mxu1 %v280_v27  ;;  %990 = vmatprep.subr.mxu0 %v263_v28  ;;  %v349_v15 = vld [vmem:[%s1794_s1 + $0x578] sm:$0xff]  ;;  %v332_v16 = vld [vmem:[%s1794_s1 + $0x4f0] sm:$0xff]  ;;  %v166_v21 = vld [vmem:[%s1358_s26 + $0x80] sm:$0xff] }
  0x3c   : > { %1028 = vmatprep.subr.mxu1 %v295_v29  ;;  %991 = vmatpush3.msra.mxu0 %v247_v30  ;;  %v364_v17 = vld [vmem:[%s1794_s1 + $0x5f0] sm:$0xff]  ;;  %v331_v22 = vld [vmem:[%s1794_s1 + $0x4e8] sm:$0xff]  ;;  %v169_v24 = vld [vmem:[%s1358_s26 + $0x98] sm:$0xff] }
  0x3d   : > { %1029 = vmatpush3.msra.mxu1 %v279_v31  ;;  %992 = vmatprep.subr.mxu0 %v262_v32  ;;  %v316_v19 = vld [vmem:[%s1794_s1 + $0x470] sm:$0xff]  ;;  %v363_v23 = vld [vmem:[%s1794_s1 + $0x5e8] sm:$0xff]  ;;  %v330_v27 = vld [vmem:[%s1794_s1 + $0x4e0] sm:$0xff] }
  0x3e   : > { %1030 = vmatprep.subr.mxu1 %v294_v33  ;;  %993 = vmatpush3.msra.mxu0 %v246_v34  ;;  %v348_v20 = vld [vmem:[%s1794_s1 + $0x570] sm:$0xff]  ;;  %v315_v25 = vld [vmem:[%s1794_s1 + $0x468] sm:$0xff]  ;;  %v362_v29 = vld [vmem:[%s1794_s1 + $0x5e0] sm:$0xff] }
  0x3f   : > { %1031 = vmatpush3.msra.mxu1 %v278_v35  ;;  %994 = vmatprep.subr.mxu0 %v261_v36  ;;  %v347_v26 = vld [vmem:[%s1794_s1 + $0x568] sm:$0xff]  ;;  %v168_v28 = vld [vmem:[%s1358_s26 + $0x90] sm:$0xff]  ;;  %v314_v30 = vld [vmem:[%s1794_s1 + $0x460] sm:$0xff] }
  0x40   : > { %1032 = vmatprep.subr.mxu1 %v293_v37  ;;  %995 = vmatpush3.msra.mxu0 %v245_v38  ;;  %v346_v31 = vld [vmem:[%s1794_s1 + $0x560] sm:$0xff]  ;;  %v329_v32 = vld [vmem:[%s1794_s1 + $0x4d8] sm:$0xff]  ;;  %v328_v36 = vld [vmem:[%s1794_s1 + $0x4d0] sm:$0xff] }
  0x41   : > { %1033 = vmatpush3.msra.mxu1 %v277_v39  ;;  %996 = vmatprep.subr.mxu0 %v260_v40  ;;  %v361_v33 = vld [vmem:[%s1794_s1 + $0x5d8] sm:$0xff]  ;;  %v360_v37 = vld [vmem:[%s1794_s1 + $0x5d0] sm:$0xff]  ;;  %v327_v40 = vld [vmem:[%s1794_s1 + $0x4c8] sm:$0xff] }
  0x42   : > { %1034 = vmatprep.subr.mxu1 %v292_v41  ;;  %997 = vmatpush3.msra.mxu0 %v244_v42  ;;  %v313_v34 = vld [vmem:[%s1794_s1 + $0x458] sm:$0xff]  ;;  %v312_v38 = vld [vmem:[%s1794_s1 + $0x450] sm:$0xff]  ;;  %v359_v41 = vld [vmem:[%s1794_s1 + $0x5c8] sm:$0xff] }
  0x43   : > { %1035 = vmatpush3.msra.mxu1 %v276_v43  ;;  %998 = vmatprep.subr.mxu0 %v259_v44  ;;  %v345_v35 = vld [vmem:[%s1794_s1 + $0x558] sm:$0xff]  ;;  %v344_v39 = vld [vmem:[%s1794_s1 + $0x550] sm:$0xff]  ;;  %v311_v42 = vld [vmem:[%s1794_s1 + $0x448] sm:$0xff] }
  0x44   : > { %1036 = vmatprep.subr.mxu1 %v291_v45  ;;  %999 = vmatpush3.msra.mxu0 %v243_v46  ;;  %v343_v43 = vld [vmem:[%s1794_s1 + $0x548] sm:$0xff]  ;;  %v326_v44 = vld [vmem:[%s1794_s1 + $0x4c0] sm:$0xff] }
  0x45   : > { %1037 = vmatpush3.msra.mxu1 %v275_v47  ;;  %1000 = vmatprep.subr.mxu0 %v258_v48  ;;  %v358_v45 = vld [vmem:[%s1794_s1 + $0x5c0] sm:$0xff]  ;;  %v325_v48 = vld [vmem:[%s1794_s1 + $0x4b8] sm:$0xff] }
  0x46   : > { %1038 = vmatprep.subr.mxu1 %v290_v49  ;;  %1001 = vmatpush3.msra.mxu0 %v242_v50  ;;  %v310_v46 = vld [vmem:[%s1794_s1 + $0x440] sm:$0xff]  ;;  %v357_v49 = vld [vmem:[%s1794_s1 + $0x5b8] sm:$0xff] }
  0x47   : > { %1039 = vmatpush3.msra.mxu1 %v274_v51  ;;  %1002 = vmatprep.subr.mxu0 %v257_v52  ;;  %v342_v47 = vld [vmem:[%s1794_s1 + $0x540] sm:$0xff]  ;;  %v309_v50 = vld [vmem:[%s1794_s1 + $0x438] sm:$0xff]  ;;  %v324_v52 = vld [vmem:[%s1794_s1 + $0x4b0] sm:$0xff] }
  0x48   : > { %1040 = vmatprep.subr.mxu1 %v289_v53  ;;  %1003 = vmatpush3.msra.mxu0 %v241_v54  ;;  %v341_v51 = vld [vmem:[%s1794_s1 + $0x538] sm:$0xff]  ;;  %v356_v53 = vld [vmem:[%s1794_s1 + $0x5b0] sm:$0xff] }
  0x49   : > { %1041 = vmatpush3.msra.mxu1 %v273_v55  ;;  %435 = vmatprep.mubr.f32.mxu0 %v163_v56  ;;  %v308_v54 = vld [vmem:[%s1794_s1 + $0x430] sm:$0xff]  ;;  %v323_v56 = vld [vmem:[%s1794_s1 + $0x4a8] sm:$0xff] }
  0x4a   : > { %510 = vmatprep.mubr.f32.mxu1 %v165_v57  ;;  %1004 = vmatprep.subr.mxu0 %v256_v58  ;;  %v340_v55 = vld [vmem:[%s1794_s1 + $0x530] sm:$0xff]  ;;  %v355_v57 = vld [vmem:[%s1794_s1 + $0x5a8] sm:$0xff] }
  0x4b   : > { %1042 = vmatprep.subr.mxu1 %v288_v59  ;;  %436 = vmatmul.mubr.f32.gmra.mxu0 %v162_v60  ;;  %v307_v58 = vld [vmem:[%s1794_s1 + $0x428] sm:$0xff]  ;;  %v322_v60 = vld [vmem:[%s1794_s1 + $0x4a0] sm:$0xff] }
  0x4c   : > { %511 = vmatmul.mubr.f32.gmra.mxu1 %v164_v61  ;;  %1005 = vmatpush3.msra.mxu0 %v240_v62  ;;  %v339_v59 = vld [vmem:[%s1794_s1 + $0x528] sm:$0xff]  ;;  %v354_v61 = vld [vmem:[%s1794_s1 + $0x5a0] sm:$0xff] }
  0x4d   : > { %1043 = vmatpush3.msra.mxu1 %v272_v63  ;;  %1006 = vmatprep.subr.mxu0 %v255_v0  ;;  %v306_v62 = vld [vmem:[%s1794_s1 + $0x420] sm:$0xff]  ;;  %v321_v0 = vld [vmem:[%s1794_s1 + $0x498] sm:$0xff] }
  0x4e   : > { %1044 = vmatprep.subr.mxu1 %v287_v1  ;;  %1007 = vmatpush3.msra.mxu0 %v239_v2  ;;  %v338_v63 = vld [vmem:[%s1794_s1 + $0x520] sm:$0xff]  ;;  %v353_v1 = vld [vmem:[%s1794_s1 + $0x598] sm:$0xff] }
  0x4f   : > { %1045 = vmatpush3.msra.mxu1 %v271_v3  ;;  %1008 = vmatprep.subr.mxu0 %v254_v4  ;;  %v305_v2 = vld [vmem:[%s1794_s1 + $0x418] sm:$0xff]  ;;  %v320_v4 = vld [vmem:[%s1794_s1 + $0x490] sm:$0xff] }
  0x50   : > { %1046 = vmatprep.subr.mxu1 %v286_v5  ;;  %1009 = vmatpush3.msra.mxu0 %v238_v6  ;;  %v337_v3 = vld [vmem:[%s1794_s1 + $0x518] sm:$0xff]  ;;  %v352_v5 = vld [vmem:[%s1794_s1 + $0x590] sm:$0xff] }
  0x51   : > { %580 = vmatprep.mubr.f32.mxu0 %v155_v7  ;;  %1047 = vmatpush3.msra.mxu1 %v270_v8  ;;  %v304_v6 = vld [vmem:[%s1794_s1 + $0x410] sm:$0xff]  ;;  %v319_v8 = vld [vmem:[%s1794_s1 + $0x488] sm:$0xff] }
  0x52   : > { %581 = vmatmul.mubr.f32.vlgmr.msra.gmra.mxu0 %v154_v9  ;;  %655 = vmatprep.mubr.f32.mxu1 %v157_v10  ;;  %v336_v7 = vld [vmem:[%s1794_s1 + $0x510] sm:$0xff]  ;;  %v351_v9 = vld [vmem:[%s1794_s1 + $0x588] sm:$0xff] }
  0x53   : > { %1054 = vmatprep.subr.mxu0 %v333_v11  ;;  %1092 = vmatprep.subr.mxu1 %v365_v12  ;;  %v303_v10 = vld [vmem:[%s1794_s1 + $0x408] sm:$0xff]  ;;  %v318_v12 = vld [vmem:[%s1794_s1 + $0x480] sm:$0xff] }
  0x54   : > { %656 = vmatmul.mubr.f32.vlgmr.msra.gmra.mxu1 %v156_v13  ;;  %1055 = vmatpush3.msra.mxu0 %v317_v14  ;;  %v335_v11 = vld [vmem:[%s1794_s1 + $0x508] sm:$0xff]  ;;  %v350_v13 = vld [vmem:[%s1794_s1 + $0x580] sm:$0xff] }
  0x55   : > { %1093 = vmatpush3.msra.mxu1 %v349_v15  ;;  %1056 = vmatprep.subr.mxu0 %v332_v16  ;;  %v302_v14 = vld [vmem:[%s1794_s1 + $0x400] sm:$0xff]  ;;  %v159_v15 = vld [vmem:[%s1358_s26 + $0x48] sm:$0xff] }
  0x56   : > { %1094 = vmatprep.subr.mxu1 %v364_v17  ;;  %585 = vmatprep.mubr.f32.mxu0 %v167_v18  ;;  %v334_v16 = vld [vmem:[%s1794_s1 + $0x500] sm:$0xff]  ;;  %v161_v17 = vld [vmem:[%s1358_s26 + $0x58] sm:$0xff] }
  0x57   : > { %1057 = vmatpush3.msra.mxu0 %v316_v19  ;;  %1095 = vmatpush3.msra.mxu1 %v348_v20  ;;  %v158_v18 = vld [vmem:[%s1358_s26 + $0x40] sm:$0xff]  ;;  %v160_v19 = vld [vmem:[%s1358_s26 + $0x50] sm:$0xff]  ;;  %v171_v20 = vld [vmem:[%s1358_s26 + $0xa8] sm:$0xff] }
  0x58   : > { %586 = vmatmul.mubr.f32.gmra.mxu0 %v166_v21  ;;  %1058 = vmatprep.subr.mxu0 %v331_v22  ;;  %v173_v21 = vld [vmem:[%s1358_s26 + $0xb8] sm:$0xff]  ;;  %v170_v22 = vld [vmem:[%s1358_s26 + $0xa0] sm:$0xff] }
  0x59   : > { %1096 = vmatprep.subr.mxu1 %v363_v23  ;;  %660 = vmatprep.mubr.f32.mxu1 %v169_v24  ;;  %v172_v23 = vld [vmem:[%s1358_s26 + $0xb0] sm:$0xff]  ;;  %s890_s26 = sshll.u32 %s1797_s15, 2 }
  0x5a   : > { %1059 = vmatpush3.msra.mxu0 %v315_v25  ;;  %1097 = vmatpush3.msra.mxu1 %v347_v26  ;;  %s148_s22 = scalar_lea.vmem %s1795_s2, %s890_s26 }
  0x5b   : > { %1060 = vmatprep.subr.mxu0 %v330_v27  ;;  %661 = vmatmul.mubr.f32.gmra.mxu1 %v168_v28 }
  0x5c   : > { %1098 = vmatprep.subr.mxu1 %v362_v29  ;;  %1061 = vmatpush3.msra.mxu0 %v314_v30 }
  0x5d   : > { %1099 = vmatpush3.msra.mxu1 %v346_v31  ;;  %1062 = vmatprep.subr.mxu0 %v329_v32 }
  0x5e   : > { %1100 = vmatprep.subr.mxu1 %v361_v33  ;;  %1063 = vmatpush3.msra.mxu0 %v313_v34 }
  0x5f   : > { %1101 = vmatpush3.msra.mxu1 %v345_v35  ;;  %1064 = vmatprep.subr.mxu0 %v328_v36 }
  0x60   : > { %1102 = vmatprep.subr.mxu1 %v360_v37  ;;  %1065 = vmatpush3.msra.mxu0 %v312_v38 }
  0x61   : > { %1103 = vmatpush3.msra.mxu1 %v344_v39  ;;  %1066 = vmatprep.subr.mxu0 %v327_v40 }
  0x62   : > { %1104 = vmatprep.subr.mxu1 %v359_v41  ;;  %1067 = vmatpush3.msra.mxu0 %v311_v42 }
  0x63   : > { %1105 = vmatpush3.msra.mxu1 %v343_v43  ;;  %1068 = vmatprep.subr.mxu0 %v326_v44 }
  0x64   : > { %1106 = vmatprep.subr.mxu1 %v358_v45  ;;  %1069 = vmatpush3.msra.mxu0 %v310_v46 }
  0x65   : > { %1107 = vmatpush3.msra.mxu1 %v342_v47  ;;  %1070 = vmatprep.subr.mxu0 %v325_v48 }
  0x66   : > { %1108 = vmatprep.subr.mxu1 %v357_v49  ;;  %1071 = vmatpush3.msra.mxu0 %v309_v50 }
  0x67   : > { %1109 = vmatpush3.msra.mxu1 %v341_v51  ;;  %1072 = vmatprep.subr.mxu0 %v324_v52 }
  0x68   : > { %1110 = vmatprep.subr.mxu1 %v356_v53  ;;  %1073 = vmatpush3.msra.mxu0 %v308_v54 }
  0x69   : > { %1111 = vmatpush3.msra.mxu1 %v340_v55  ;;  %1074 = vmatprep.subr.mxu0 %v323_v56 }
  0x6a   : > { %1112 = vmatprep.subr.mxu1 %v355_v57  ;;  %1075 = vmatpush3.msra.mxu0 %v307_v58 }
  0x6b   : > { %1113 = vmatpush3.msra.mxu1 %v339_v59  ;;  %1076 = vmatprep.subr.mxu0 %v322_v60 }
  0x6c   : > { %1114 = vmatprep.subr.mxu1 %v354_v61  ;;  %1077 = vmatpush3.msra.mxu0 %v306_v62 }
  0x6d   : > { %1115 = vmatpush3.msra.mxu1 %v338_v63  ;;  %1078 = vmatprep.subr.mxu0 %v321_v0 }
  0x6e   : > { %1116 = vmatprep.subr.mxu1 %v353_v1  ;;  %1079 = vmatpush3.msra.mxu0 %v305_v2 }
  0x6f   : > { %1117 = vmatpush3.msra.mxu1 %v337_v3  ;;  %1080 = vmatprep.subr.mxu0 %v320_v4 }
  0x70   : > { %1118 = vmatprep.subr.mxu1 %v352_v5  ;;  %1081 = vmatpush3.msra.mxu0 %v304_v6 }
  0x71   : > { %1119 = vmatpush3.msra.mxu1 %v336_v7  ;;  %1082 = vmatprep.subr.mxu0 %v319_v8 }
  0x72   : > { %1120 = vmatprep.subr.mxu1 %v351_v9  ;;  %1083 = vmatpush3.msra.mxu0 %v303_v10 }
  0x73   : > { %1121 = vmatpush3.msra.mxu1 %v335_v11  ;;  %1084 = vmatprep.subr.mxu0 %v318_v12 }
  0x74   : > { %1122 = vmatprep.subr.mxu1 %v350_v13  ;;  %1085 = vmatpush3.msra.mxu0 %v302_v14 }
  0x75   : > { %730 = vmatprep.mubr.f32.mxu0 %v159_v15  ;;  %1123 = vmatpush3.msra.mxu1 %v334_v16 }
  0x76   : > { %805 = vmatprep.mubr.f32.mxu1 %v161_v17  ;;  %731 = vmatmul.mubr.f32.vlgmr.msra.gmra.mxu0 %v158_v18 }
  0x77   : > { %806 = vmatmul.mubr.f32.vlgmr.msra.gmra.mxu1 %v160_v19  ;;  %735 = vmatprep.mubr.f32.mxu0 %v171_v20 }
  0x78   : > { %810 = vmatprep.mubr.f32.mxu1 %v173_v21 }
  0x7a   : > { %736 = vmatmul.mubr.f32.gmra.mxu0 %v170_v22 }
  0x7b   : > { %811 = vmatmul.mubr.f32.gmra.mxu1 %v172_v23 }
  0xee   : > { %v934_v24 = vpop.f32.mrf.mxu0 }
  0xef   : > { %v972_v25 = vpop.f32.mrf.mxu1 }
  0xf0   : > { %v935_v26 = vpop.f32.mrf.mxu0 }
  0xf1   : > { %v973_v28 = vpop.f32.mrf.mxu1  ;;  %v936_v38 = vadd.f32 %v935_v26, %v934_v24 }
  0xf2   : > { %v974_v39 = vadd.f32 %v973_v28, %v972_v25 }
  0xf4   : > { %v508_v45 = vadd.f32 %v974_v39, %v936_v38 }
 0x10b   : > { %v937_v27 = vpop.f32.mrf.mxu0 }
 0x10c   : > { %v975_v29 = vpop.f32.mrf.mxu1 }
 0x10d   : > { %v938_v30 = vpop.f32.mrf.mxu0 }
 0x10e   : > { %v976_v31 = vpop.f32.mrf.mxu1  ;;  %v939_v41 = vadd.f32 %v938_v30, %v937_v27 }
 0x10f   : > { %v977_v42 = vadd.f32 %v976_v31, %v975_v29 }
 0x111   : > { %v513_v49 = vadd.f32 %v977_v42, %v939_v41 }
 0x112   : > { %v1010_v32 = vpop.f32.mrf.mxu0 }
 0x114   : > { %v1048_v33 = vpop.f32.mrf.mxu1  ;;  %v1011_v34 = vpop.f32.mrf.mxu0 }
 0x115   : > { %v1012_v43 = vadd.f32 %v1011_v34, %v1010_v32 }
 0x116   : > { %v1049_v35 = vpop.f32.mrf.mxu1 }
 0x117   : > { %v583_v50 = vadd.f32 %v1012_v43, %v508_v45  ;;  %v1050_v51 = vadd.f32 %v1049_v35, %v1048_v33 }
 0x118   : > { %v1013_v36 = vpop.f32.mrf.mxu0 }
 0x119   : > { %v658_v59 = vadd.f32 %v1050_v51, %v583_v50 }
 0x11a   : > { %v1014_v40 = vpop.f32.mrf.mxu0 }
 0x11b   : > { %v1051_v37 = vpop.f32.mrf.mxu1  ;;  %v1015_v46 = vadd.f32 %v1014_v40, %v1013_v36 }
 0x11d   : > { %v1052_v44 = vpop.f32.mrf.mxu1  ;;  %v588_v54 = vadd.f32 %v1015_v46, %v513_v49 }
 0x11e   : > { %v1053_v55 = vadd.f32 %v1052_v44, %v1051_v37 }
 0x120   : > { %v663_v62 = vadd.f32 %v1053_v55, %v588_v54 }
 0x136   : > { %v1086_v47 = vpop.f32.mrf.mxu0 }
 0x137   : > { %v1124_v48 = vpop.f32.mrf.mxu1 }
 0x138   : > { %v1087_v52 = vpop.f32.mrf.mxu0 }
 0x139   : > { %v1125_v53 = vpop.f32.mrf.mxu1  ;;  %v1088_v56 = vadd.f32 %v1087_v52, %v1086_v47 }
 0x13a   : > { %v1089_v57 = vpop.f32.mrf.mxu0  ;;  %v1126_v1 = vadd.f32 %v1125_v53, %v1124_v48 }
 0x13b   : > { %v1127_v58 = vpop.f32.mrf.mxu1  ;;  %v733_v63 = vadd.f32 %v1088_v56, %v658_v59 }
 0x13c   : > { %v1090_v60 = vpop.f32.mrf.mxu0 }
 0x13d   : > { %v1128_v61 = vpop.f32.mrf.mxu1  ;;  %v1091_v0 = vadd.f32 %v1090_v60, %v1089_v57  ;;  %v808_v4 = vadd.f32 %v1126_v1, %v733_v63 }
 0x13e   : > { %v1129_v3 = vadd.f32 %v1128_v61, %v1127_v58 }
 0x13f   : > { %v738_v2 = vadd.f32 %v1091_v0, %v663_v62 }
 0x141   : > { %v813_v5 = vadd.f32 %v1129_v3, %v738_v2 }
 0x143   : > { %v900_v6 = vpack.c.bf16 %v813_v5, %v808_v4 }
 0x145   : > { %901 = vst [vmem:[%s148_s22] sm:$0xff] %v900_v6  }
 0x146 PF: > { %s12_s9 = sadd.s32 1, %s1145_s9  }
 0x147   : > { %p9_p4 = scmp.ge.s32.totalorder %s12_s9, 4  }
 0x149   :  { %11 = sbr.rel (!%p9_p4) target bundleno = 1 (0x1), region = 58 }

</bundles_post_ra>
